<compile_context>
chip_gen: v7x
topology: tpu7x:2x2x1
jax: 0.10.0
libtpu: 0.0.40
codegen_flags: <defaults>
</compile_context>

<pallas_src>
import jax
import jax.numpy as jnp
from jax import lax
from jax.experimental import pallas as pl
from jax.experimental.pallas import tpu as pltpu


def _round_up(x, m):
    return ((x + m - 1) // m) * m


def classifier_kernel(idx_ref, logit_ref, out_ref):
    # idx_ref  : (TN, 1)        int32 token/op indices for this tile (-1 marks padding)
    # logit_ref: (K_PAD, C_PAD) f32 fused logit table  L = emb @ W^T + b (zero padded)
    # out_ref  : (TN, n_ops)    f32 logits, TRUE width (no lane padding written to HBM)
    idx = idx_ref[...]                                    # (TN, 1)
    tn = idx.shape[0]
    k_pad = logit_ref.shape[0]
    n_out = out_ref.shape[1]

    # Exact one-hot gather fed straight to the MXU: (TN, K_PAD) @ (K_PAD, C_PAD)
    col = lax.broadcasted_iota(jnp.int32, (tn, k_pad), 1)
    onehot = (idx == col).astype(logit_ref.dtype)
    res = jnp.dot(onehot, logit_ref[...], preferred_element_type=jnp.float32)
    # Store only the real columns; padding columns of `res` are all zero anyway.
    out_ref[...] = res[:, :n_out]


def classifier_forward(x, emb_table, fc_w, fc_b, *, tile_n=1024):
    """x: int array of any shape; returns logits of shape x.shape + (n_ops,)."""
    orig_shape = x.shape
    n_ops, emb_dim = emb_table.shape

    # Algorithmic fusion (done once, outside the per-token kernel):
    #   L[i, :] = emb_table[i, :] @ fc_w.T + fc_b   -> fc(emb(i))
    logit_table = (emb_table @ fc_w.T + fc_b[None, :]).astype(jnp.float32)

    # Pad the one-hot (K) width and the matmul-operand (C) lanes up to 128 so the MXU
    # tiles are aligned.  Only the operands are padded; the OUTPUT stays n_ops wide.
    k_pad = _round_up(n_ops, 128)
    c_pad = _round_up(n_ops, 128)
    logit_pad = (
        jnp.zeros((k_pad, c_pad), jnp.float32).at[:n_ops, :n_ops].set(logit_table)
    )

    idx = x.reshape(-1, 1).astype(jnp.int32)              # (N, 1)
    n = idx.shape[0]
    # Adaptive row tile: big (1024) for throughput, but never over-pad tiny inputs.
    tile_n = max(128, min(tile_n, _round_up(max(n, 1), 128)))
    n_pad = _round_up(max(n, 1), tile_n)
    if n_pad != n:
        # pad with -1 -> all-zero one-hot rows; their (zero) outputs are sliced off below
        idx = jnp.pad(idx, ((0, n_pad - n), (0, 0)), constant_values=-1)

    # VMEM budget: table (double-buffered by the pipeline) + per-step idx/out tiles
    # (double-buffered) + the (tile_n, c_pad) matmul result, with ~25% headroom.
    table_bytes = k_pad * c_pad * 4
    step_bytes = tile_n * (1 + c_pad + n_ops) * 4
    vmem_bytes = int(1.25 * (2 * table_bytes + 2 * step_bytes))
    vmem_bytes = min(max(vmem_bytes, 32 << 20), 64 << 20)  # valid on v5e/v6e/v7x

    cost = pl.CostEstimate(
        flops=2 * n_pad * k_pad * c_pad,
        transcendentals=0,
        bytes_accessed=n_pad * 4 + table_bytes + n_pad * n_ops * 4,
    )

    out = pl.pallas_call(
        classifier_kernel,
        out_shape=jax.ShapeDtypeStruct((n_pad, n_ops), jnp.float32),
        grid=(n_pad // tile_n,),
        in_specs=[
            pl.BlockSpec((tile_n, 1), lambda i: (i, 0)),       # index tile (streamed)
            pl.BlockSpec((k_pad, c_pad), lambda i: (0, 0)),    # fused logit table (resident)
        ],
        out_specs=pl.BlockSpec((tile_n, n_ops), lambda i: (i, 0)),  # true-width output
        compiler_params=pltpu.CompilerParams(
            dimension_semantics=("parallel",),                 # shard grid across TCs (v7x)
            vmem_limit_bytes=vmem_bytes,
        ),
        cost_estimate=cost,
    )(idx, logit_pad)

    return out[:n].reshape(*orig_shape, n_ops)


if __name__ == "__main__":
    # Small synthetic config consistent with Classifier(n_ops, emb_dim=16)
    n_ops, emb_dim = 12, 16
    batch, seq = 2, 8

    key = jax.random.PRNGKey(0)
    k_emb, k_w, k_b, k_x = jax.random.split(key, 4)

    # Deterministic parameter init (shapes match nn.Embedding / nn.Linear)
    emb_table = jax.random.normal(k_emb, (n_ops, emb_dim), dtype=jnp.float32)
    bound = 1.0 / (emb_dim ** 0.5)
    fc_w = jax.random.uniform(k_w, (n_ops, emb_dim), jnp.float32, -bound, bound)
    fc_b = jax.random.uniform(k_b, (n_ops,), jnp.float32, -bound, bound)

    # Integer op-index inputs
    x = jax.random.randint(k_x, (batch, seq), 0, n_ops, dtype=jnp.int32)

    out = classifier_forward(x, emb_table, fc_w, fc_b)
    out = jax.block_until_ready(out)

    # Pure-JAX reference check
    ref = jnp.take(emb_table, x, axis=0) @ fc_w.T + fc_b
    assert out.shape == (batch, seq, n_ops), out.shape
    assert jnp.allclose(out, ref, atol=1e-5, rtol=1e-5), "mismatch vs reference"

    print("KERNEL_OK")
</pallas_src>

<mosaic_0001>
module attributes {stable_mosaic.version = 11 : i64} {
  func.func @classifier_kernel(%arg0: i32, %arg1: memref<128x1xi32, #tpu.memory_space<vmem>>, %arg2: memref<128x128xf32, #tpu.memory_space<vmem>>, %arg3: memref<128x12xf32, #tpu.memory_space<vmem>>) attributes {dimension_semantics = [#tpu.dimension_semantics<parallel>], iteration_bounds = array<i64: 1>, scalar_prefetch = 0 : i64, scratch_operands = 0 : i64, tpu.core_type = #tpu.core_type<tc>, window_params = [{transform_indices = @transform_0, window_bounds = array<i64: 128, 1>}, {pipeline_mode = #tpu.pipeline_mode<synchronous>, transform_indices = @transform_1, window_bounds = array<i64: 128, 128>}, {transform_indices = @transform_2, window_bounds = array<i64: 128, 12>}]} {
    %c0 = arith.constant 0 : index
    %c0_0 = arith.constant 0 : index
    %0 = vector.load %arg1[%c0, %c0_0] : memref<128x1xi32, #tpu.memory_space<vmem>>, vector<128x1xi32>
    %1 = tpu.iota {dimensions = array<i32: 1>} : vector<128x128xi32>
    %2 = vector.broadcast %0 : vector<128x1xi32> to vector<128x128xi32>
    %3 = arith.cmpi eq, %2, %1 : vector<128x128xi32>
    %4 = arith.extui %3 : vector<128x128xi1> to vector<128x128xi32>
    %5 = arith.sitofp %4 : vector<128x128xi32> to vector<128x128xf32>
    %c0_1 = arith.constant 0 : index
    %c0_2 = arith.constant 0 : index
    %6 = vector.load %arg2[%c0_1, %c0_2] : memref<128x128xf32, #tpu.memory_space<vmem>>, vector<128x128xf32>
    %cst = arith.constant dense<0.000000e+00> : vector<128x128xf32>
    %7 = tpu.matmul %5, %6, %cst {dimension_numbers = #tpu.dot_dimension_numbers<[1], [0], [0], [1], [0, 0, 1, 1], [], []>} : vector<128x128xf32>, vector<128x128xf32>, vector<128x128xf32> -> vector<128x128xf32>
    %8 = vector.extract_strided_slice %7 {offsets = [0, 0], sizes = [128, 12], strides = [1, 1]} : vector<128x128xf32> to vector<128x12xf32>
    %c0_3 = arith.constant 0 : index
    %c0_4 = arith.constant 0 : index
    %9 = vector.load %arg3[%c0_3, %c0_4] : memref<128x12xf32, #tpu.memory_space<vmem>>, vector<128x12xf32>
    tpu.vector_store %arg3[%c0_3, %c0_4], %8 {strides = array<i32>} : memref<128x12xf32, #tpu.memory_space<vmem>>, vector<128x12xf32>,
    return
  }
  func.func @transform_0(%arg0: i32) -> (i32, i32) {
    %c0_i32 = arith.constant 0 : i32
    %c0_i32_0 = arith.constant 0 : i32
    return %arg0, %c0_i32 : i32, i32
  }
  func.func @transform_1(%arg0: i32) -> (i32, i32) {
    %c0_i32 = arith.constant 0 : i32
    %c0_i32_0 = arith.constant 0 : i32
    %c0_i32_1 = arith.constant 0 : i32
    return %c0_i32, %c0_i32_0 : i32, i32
  }
  func.func @transform_2(%arg0: i32) -> (i32, i32) {
    %c0_i32 = arith.constant 0 : i32
    %c0_i32_0 = arith.constant 0 : i32
    return %arg0, %c0_i32 : i32, i32
  }
}

</mosaic_0001>

<bundles_post_ra>
// kernel: tpu_custom_call.1
= control target key start
LH: loop header
LB: loop body
LE: loop exit
PB: predicated region body
PF: predicated region fallthrough
CT: control target
= control target key end

     0   :  { %v479_v0 = vmov 0   ;;  %v27_v41 = vlaneseq  ;;  %v480_v45 = vmov 1.0   ;;  %s656_s0 = inlined_call_operand.vmem [shape: s32[128,1], index: 0, kind: input, shape index: {}]   ;;  %s657_s1 = inlined_call_operand.vmem [shape: f32[128,128], index: 1, kind: input, shape index: {}]   ;;  %s658_s2 = inlined_call_operand.vmem [shape: f32[128,12], index: 2, kind: output, shape index: {}]  }
   0x1   :  { %478 = vset.pattern.permute.xlu1 %v479_v0  ;;  %477 = vset.pattern.permute.xlu0 %v479_v0  ;;  %v12_v1 = vld [vmem:[%s656_s0 + $0x8] sm:$0xff]  ;;  %v11_v2 = vld [vmem:[%s656_s0] sm:$0xff]  ;;  %v21_v5 = vld [vmem:[%s656_s0 + $0x50] sm:$0xff] }
   0x2   :  { %33 = vperm.xlu1 %478, %v12_v1   ;;  %30 = vperm.xlu0 %477, %v11_v2   ;;  %v20_v3 = vld [vmem:[%s656_s0 + $0x48] sm:$0xff]  ;;  %v19_v4 = vld [vmem:[%s656_s0 + $0x40] sm:$0xff]  ;;  %v13_v8 = vld [vmem:[%s656_s0 + $0x10] sm:$0xff]  ;;  %v28_v42 = vand.u32 127, %v27_v41 }
   0x3   :  { %v125_v6 = vld [vmem:[%s657_s1] sm:$0xff]  ;;  %v126_v7 = vld [vmem:[%s657_s1 + $0x8] sm:$0xff]  ;;  %v127_v10 = vld [vmem:[%s657_s1 + $0x10] sm:$0xff] }
   0x4   :  { %v427_v9 = vpack.c.bf16 %v126_v7, %v125_v6  ;;  %v128_v11 = vld [vmem:[%s657_s1 + $0x18] sm:$0xff]  ;;  %v129_v13 = vld [vmem:[%s657_s1 + $0x20] sm:$0xff]  ;;  %v130_v14 = vld [vmem:[%s657_s1 + $0x28] sm:$0xff] }
   0x5   :  { %v431_v12 = vpack.c.bf16 %v128_v11, %v127_v10  ;;  %v22_v15 = vld [vmem:[%s656_s0 + $0x58] sm:$0xff]  ;;  %v435_v17 = vpack.c.bf16 %v130_v14, %v129_v13  ;;  %v131_v18 = vld [vmem:[%s657_s1 + $0x30] sm:$0xff]  ;;  %v23_v20 = vld [vmem:[%s656_s0 + $0x60] sm:$0xff] }
   0x6   :  { %57 = vperm.xlu1 %478, %v20_v3   ;;  %54 = vperm.xlu0 %477, %v19_v4   ;;  %v14_v16 = vld [vmem:[%s656_s0 + $0x18] sm:$0xff]  ;;  %v15_v21 = vld [vmem:[%s656_s0 + $0x20] sm:$0xff]  ;;  %v134_v24 = vld [vmem:[%s657_s1 + $0x48] sm:$0xff] }
   0x7   :  { %428 = vmatprep.subr.bf16.mxu0 %v427_v9  ;;  %459 = vmatprep.subr.bf16.mxu1 %v427_v9  ;;  %v132_v19 = vld [vmem:[%s657_s1 + $0x38] sm:$0xff]  ;;  %v133_v23 = vld [vmem:[%s657_s1 + $0x40] sm:$0xff]  ;;  %v24_v25 = vld [vmem:[%s656_s0 + $0x68] sm:$0xff] }
   0x8   :  { %430 = vmatpush3.bf16.msra.mxu0 %v427_v9  ;;  %467 = vmatpush3.bf16.msra.mxu1 %v427_v9  ;;  %v439_v22 = vpack.c.bf16 %v132_v19, %v131_v18  ;;  %v16_v26 = vld [vmem:[%s656_s0 + $0x28] sm:$0xff]  ;;  %v443_v27 = vpack.c.bf16 %v134_v24, %v133_v23  ;;  %v135_v28 = vld [vmem:[%s657_s1 + $0x50] sm:$0xff]  ;;  %v136_v29 = vld [vmem:[%s657_s1 + $0x58] sm:$0xff] }
   0x9   :  { %432 = vmatprep.subr.bf16.mxu0 %v431_v12  ;;  %460 = vmatprep.subr.bf16.mxu1 %v431_v12  ;;  %v25_v30 = vld [vmem:[%s656_s0 + $0x70] sm:$0xff]  ;;  %v447_v32 = vpack.c.bf16 %v136_v29, %v135_v28  ;;  %v137_v33 = vld [vmem:[%s657_s1 + $0x60] sm:$0xff]  ;;  %v138_v34 = vld [vmem:[%s657_s1 + $0x68] sm:$0xff] }
   0xa   :  { %60 = vperm.xlu1 %478, %v21_v5   ;;  %36 = vperm.xlu0 %477, %v13_v8   ;;  %v17_v31 = vld [vmem:[%s656_s0 + $0x30] sm:$0xff]  ;;  %v26_v35 = vld [vmem:[%s656_s0 + $0x78] sm:$0xff]  ;;  %v451_v37 = vpack.c.bf16 %v138_v34, %v137_v33 }
   0xb   :  { %v18_v36 = vld [vmem:[%s656_s0 + $0x38] sm:$0xff]  ;;  %v139_v38 = vld [vmem:[%s657_s1 + $0x70] sm:$0xff] }
   0xc   :  { %434 = vmatpush3.bf16.msra.mxu0 %v431_v12  ;;  %468 = vmatpush3.bf16.msra.mxu1 %v431_v12  ;;  %v140_v39 = vld [vmem:[%s657_s1 + $0x78] sm:$0xff] }
   0xd   :  { %436 = vmatprep.subr.bf16.mxu0 %v435_v17  ;;  %461 = vmatprep.subr.bf16.mxu1 %v435_v17  ;;  %v455_v40 = vpack.c.bf16 %v140_v39, %v139_v38 }
   0xe   :  { %63 = vperm.xlu1 %478, %v22_v15   ;;  %39 = vperm.xlu0 %477, %v14_v16  }
  0x10   :  { %438 = vmatpush3.bf16.msra.mxu0 %v435_v17  ;;  %469 = vmatpush3.bf16.msra.mxu1 %v435_v17 }
  0x11   :  { %440 = vmatprep.subr.bf16.mxu0 %v439_v22  ;;  %462 = vmatprep.subr.bf16.mxu1 %v439_v22 }
  0x12   :  { %66 = vperm.xlu1 %478, %v23_v20   ;;  %42 = vperm.xlu0 %477, %v15_v21  }
  0x14   :  { %442 = vmatpush3.bf16.msra.mxu0 %v439_v22  ;;  %470 = vmatpush3.bf16.msra.mxu1 %v439_v22 }
  0x15   :  { %444 = vmatprep.subr.bf16.mxu0 %v443_v27  ;;  %463 = vmatprep.subr.bf16.mxu1 %v443_v27 }
  0x16   :  { %69 = vperm.xlu1 %478, %v24_v25   ;;  %45 = vperm.xlu0 %477, %v16_v26  }
  0x18   :  { %446 = vmatpush3.bf16.msra.mxu0 %v443_v27  ;;  %471 = vmatpush3.bf16.msra.mxu1 %v443_v27 }
  0x19   :  { %448 = vmatprep.subr.bf16.mxu0 %v447_v32  ;;  %464 = vmatprep.subr.bf16.mxu1 %v447_v32 }
  0x1a   :  { %72 = vperm.xlu1 %478, %v25_v30   ;;  %48 = vperm.xlu0 %477, %v17_v31  }
  0x1c   :  { %450 = vmatpush3.bf16.msra.mxu0 %v447_v32  ;;  %472 = vmatpush3.bf16.msra.mxu1 %v447_v32 }
  0x1d   :  { %452 = vmatprep.subr.bf16.mxu0 %v451_v37  ;;  %465 = vmatprep.subr.bf16.mxu1 %v451_v37 }
  0x1e   :  { %75 = vperm.xlu1 %478, %v26_v35   ;;  %51 = vperm.xlu0 %477, %v18_v36  }
  0x20   :  { %454 = vmatpush3.bf16.msra.mxu0 %v451_v37  ;;  %473 = vmatpush3.bf16.msra.mxu1 %v451_v37 }
  0x21   :  { %456 = vmatprep.subr.bf16.mxu0 %v455_v40  ;;  %466 = vmatprep.subr.bf16.mxu1 %v455_v40 }
  0x24   :  { %458 = vmatpush3.bf16.msra.mxu0 %v455_v40  ;;  %474 = vmatpush3.bf16.msra.mxu1 %v455_v40 }
  0x81   :  { %v34_v43 = vpop.permute.xlu1 %33  ;;  %v31_v44 = vpop.permute.xlu0 %30 }
  0x82   :  { %vm78_vm0 = vcmp.eq.s32.totalorder %v34_v43, %v28_v42  ;;  %vm77_vm1 = vcmp.eq.s32.totalorder %v31_v44, %v28_v42 }
  0x83   :  { %403 = vmatprep.mubr.msk.f32.mxu0 %vm77_vm1, %v480_v45 }
  0x84   :  { %404 = vmatmul.mubr.msk.f32.vlgmr.msra.gmra.mrb[0].mxu0 %vm78_vm0, %v480_v45  ;;  %vm286_vm0 = vcmask 97280  }
  0x85   :  { %v58_v46 = vpop.permute.xlu1 %57  ;;  %v55_v47 = vpop.permute.xlu0 %54 }
  0x86   :  { %vm86_vm2 = vcmp.eq.s32.totalorder %v58_v46, %v28_v42  ;;  %vm85_vm3 = vcmp.eq.s32.totalorder %v55_v47, %v28_v42 }
  0x87   :  { %415 = vmatprep.mubr.msk.f32.mxu1 %vm85_vm3, %v480_v45 }
  0x88   :  { %416 = vmatmul.mubr.msk.f32.vlgmr.msra.gmra.mrb[0].mxu1 %vm86_vm2, %v480_v45 }
  0x89   :  { %v61_v48 = vpop.permute.xlu1 %60  ;;  %v37_v49 = vpop.permute.xlu0 %36 }
  0x8a   :  { %vm87_vm4 = vcmp.eq.s32.totalorder %v61_v48, %v28_v42  ;;  %vm79_vm5 = vcmp.eq.s32.totalorder %v37_v49, %v28_v42 }
  0x8b   :  { %406 = vmatprep.mubr.msk.f32.mxu0 %vm79_vm5, %v480_v45  ;;  %418 = vmatprep.mubr.msk.f32.mxu1 %vm87_vm4, %v480_v45 }
  0x8d   :  { %v64_v50 = vpop.permute.xlu1 %63  ;;  %v40_v51 = vpop.permute.xlu0 %39 }
  0x8e   :  { %vm88_vm6 = vcmp.eq.s32.totalorder %v64_v50, %v28_v42  ;;  %vm80_vm7 = vcmp.eq.s32.totalorder %v40_v51, %v28_v42 }
  0x8f   :  { %407 = vmatmul.mubr.msk.f32.gmra.mrb[2].mxu0 %vm80_vm7, %v480_v45  ;;  %419 = vmatmul.mubr.msk.f32.gmra.mrb[2].mxu1 %vm88_vm6, %v480_v45 }
  0x91   :  { %v67_v52 = vpop.permute.xlu1 %66  ;;  %v43_v53 = vpop.permute.xlu0 %42 }
  0x92   :  { %vm89_vm8 = vcmp.eq.s32.totalorder %v67_v52, %v28_v42  ;;  %vm81_vm9 = vcmp.eq.s32.totalorder %v43_v53, %v28_v42 }
  0x93   :  { %409 = vmatprep.mubr.msk.f32.mxu0 %vm81_vm9, %v480_v45  ;;  %421 = vmatprep.mubr.msk.f32.mxu1 %vm89_vm8, %v480_v45 }
  0x95   :  { %v70_v54 = vpop.permute.xlu1 %69  ;;  %v46_v55 = vpop.permute.xlu0 %45 }
  0x96   :  { %vm90_vm10 = vcmp.eq.s32.totalorder %v70_v54, %v28_v42  ;;  %vm82_vm11 = vcmp.eq.s32.totalorder %v46_v55, %v28_v42 }
  0x97   :  { %410 = vmatmul.mubr.msk.f32.gmra.mrb[4].mxu0 %vm82_vm11, %v480_v45  ;;  %422 = vmatmul.mubr.msk.f32.gmra.mrb[4].mxu1 %vm90_vm10, %v480_v45 }
  0x99   :  { %v73_v56 = vpop.permute.xlu1 %72  ;;  %v49_v57 = vpop.permute.xlu0 %48 }
  0x9a   :  { %vm91_vm12 = vcmp.eq.s32.totalorder %v73_v56, %v28_v42  ;;  %vm83_vm13 = vcmp.eq.s32.totalorder %v49_v57, %v28_v42 }
  0x9b   :  { %412 = vmatprep.mubr.msk.f32.mxu0 %vm83_vm13, %v480_v45  ;;  %424 = vmatprep.mubr.msk.f32.mxu1 %vm91_vm12, %v480_v45 }
  0x9d   :  { %v76_v58 = vpop.permute.xlu1 %75  ;;  %v52_v59 = vpop.permute.xlu0 %51 }
  0x9e   :  { %vm92_vm14 = vcmp.eq.s32.totalorder %v76_v58, %v28_v42  ;;  %vm84_vm15 = vcmp.eq.s32.totalorder %v52_v59, %v28_v42 }
  0x9f   :  { %413 = vmatmul.mubr.msk.f32.gmra.mrb[6].mxu0 %vm84_vm15, %v480_v45  ;;  %425 = vmatmul.mubr.msk.f32.gmra.mrb[6].mxu1 %vm92_vm14, %v480_v45 }
 0x157   :  { %v405_v60 = vpop.f32.mrb[0].mxu0 }
 0x158   :  { %288 = vst.msk [vmem:[%s658_s2 + $0x8] sm:$0xff] %vm286_vm0, %v405_v60  ;;  %v207_v61 = vpop.f32.mrb[1].mxu0 }
 0x159   :  { %287 = vst.msk [vmem:[%s658_s2] sm:$0xff] %vm286_vm0, %v207_v61 }
 0x15b   :  { %v417_v62 = vpop.f32.mrb[0].mxu1 }
 0x15c   :  { %296 = vst.msk [vmem:[%s658_s2 + $0x48] sm:$0xff] %vm286_vm0, %v417_v62  ;;  %v247_v63 = vpop.f32.mrb[1].mxu1 }
 0x15d   :  { %295 = vst.msk [vmem:[%s658_s2 + $0x40] sm:$0xff] %vm286_vm0, %v247_v63 }
 0x162   :  { %v408_v0 = vpop.f32.mrb[2].mxu0  ;;  %v420_v1 = vpop.f32.mrb[2].mxu1 }
 0x163   :  { %290 = vst.msk [vmem:[%s658_s2 + $0x18] sm:$0xff] %vm286_vm0, %v408_v0  ;;  %298 = vst.msk [vmem:[%s658_s2 + $0x58] sm:$0xff] %vm286_vm0, %v420_v1  ;;  %v217_v2 = vpop.f32.mrb[3].mxu0  ;;  %v257_v3 = vpop.f32.mrb[3].mxu1 }
 0x164   :  { %289 = vst.msk [vmem:[%s658_s2 + $0x10] sm:$0xff] %vm286_vm0, %v217_v2  ;;  %297 = vst.msk [vmem:[%s658_s2 + $0x50] sm:$0xff] %vm286_vm0, %v257_v3 }
 0x16a   :  { %v411_v4 = vpop.f32.mrb[4].mxu0  ;;  %v423_v5 = vpop.f32.mrb[4].mxu1 }
 0x16b   :  { %292 = vst.msk [vmem:[%s658_s2 + $0x28] sm:$0xff] %vm286_vm0, %v411_v4  ;;  %300 = vst.msk [vmem:[%s658_s2 + $0x68] sm:$0xff] %vm286_vm0, %v423_v5  ;;  %v227_v6 = vpop.f32.mrb[5].mxu0  ;;  %v267_v7 = vpop.f32.mrb[5].mxu1 }
 0x16c   :  { %291 = vst.msk [vmem:[%s658_s2 + $0x20] sm:$0xff] %vm286_vm0, %v227_v6  ;;  %299 = vst.msk [vmem:[%s658_s2 + $0x60] sm:$0xff] %vm286_vm0, %v267_v7 }
 0x172   :  { %v414_v8 = vpop.f32.mrb[6].mxu0  ;;  %v426_v9 = vpop.f32.mrb[6].mxu1 }
 0x173   :  { %294 = vst.msk [vmem:[%s658_s2 + $0x38] sm:$0xff] %vm286_vm0, %v414_v8  ;;  %302 = vst.msk [vmem:[%s658_s2 + $0x78] sm:$0xff] %vm286_vm0, %v426_v9  ;;  %v237_v10 = vpop.f32.mrb[7].mxu0  ;;  %v277_v11 = vpop.f32.mrb[7].mxu1 }
 0x174   :  { %293 = vst.msk [vmem:[%s658_s2 + $0x30] sm:$0xff] %vm286_vm0, %v237_v10  ;;  %301 = vst.msk [vmem:[%s658_s2 + $0x70] sm:$0xff] %vm286_vm0, %v277_v11 }

</bundles_post_ra>
